<compile_context>
chip_gen: v5e
topology: v5e:2x2
jax: 0.10.0
libtpu: 0.0.40
codegen_flags: <defaults>
</compile_context>

<pallas_src>
import jax
import jax.numpy as jnp
from jax.experimental import pallas as pl
from jax.experimental.pallas import tpu as pltpu


# ----------------------------- kernels -------------------------------------


def _mlp_kernel(x_ref, w1_ref, b1_ref, w2_ref, b2_ref, w3_ref, b3_ref, z_ref):
    """ReLU(x@W1+b1) -> ReLU(.@W2+b2) -> .@W3+b3 -> L2 normalize (per batch tile)."""
    x = x_ref[...].astype(jnp.bfloat16)
    h = jnp.dot(x, w1_ref[...], preferred_element_type=jnp.float32) + b1_ref[...]
    h = jnp.maximum(h, 0.0)
    h = jnp.dot(h.astype(jnp.bfloat16), w2_ref[...],
                preferred_element_type=jnp.float32) + b2_ref[...]
    h = jnp.maximum(h, 0.0)
    z = jnp.dot(h.astype(jnp.bfloat16), w3_ref[...],
                preferred_element_type=jnp.float32) + b3_ref[...]
    # F.normalize(dim=-1): z / clamp_min(||z||_2, 1e-12)  ==  z * rsqrt(max(ssq, 1e-24))
    ssq = jnp.sum(z * z, axis=-1, keepdims=True)
    inv = jax.lax.rsqrt(jnp.maximum(ssq, 1e-24))   # EUP rsqrt; avoids VALU divide
    z_ref[...] = (z * inv).astype(z_ref.dtype)


def _last_layer_kernel(z_ref, vt_ref, scale_ref, o_ref):
    """y_tile = (z @ v.T_tile) * (g/||v||)_tile  ==  z @ W_eff^T tile."""
    acc = jnp.dot(z_ref[...].astype(jnp.bfloat16), vt_ref[...],
                  preferred_element_type=jnp.float32)
    o_ref[...] = (acc * scale_ref[...]).astype(o_ref.dtype)


# ----------------------------- wrapper --------------------------------------


def dino_head_forward(x, params, *, bm=128, tn=2048, vmem_limit_bytes=None):
    """x: (B, in_dim) float32.  params: dict of torch-convention weights.

    bm: batch tile (multiple of 8; >=128 recommended on real shapes).
    tn: out_dim tile (multiple of 128; re-derive for v7x's 64 MiB VMEM).
    vmem_limit_bytes: optional override of the scoped-VMEM default
                      (needed on v5e/v6e at production shapes).
    """
    B, in_dim = x.shape
    hidden = params["w1"].shape[0]
    bottleneck = params["w3"].shape[0]
    out_dim = params["v_last"].shape[0]

    bm = min(bm, B)
    tn = min(tn, out_dim)
    assert B % bm == 0, (B, bm)
    assert out_dim % tn == 0, (out_dim, tn)
    assert bm % 8 == 0 or bm == B, bm
    assert tn % 128 == 0 or tn == out_dim, tn

    # bf16 weights (half the HBM->VMEM bytes, full bf16 MXU throughput),
    # transposed to (in, out) so kernels compute plain x @ W.
    # Biases / scales stay f32 (elementwise path, esp. v5e which has no bf16 VPU).
    w1 = params["w1"].T.astype(jnp.bfloat16)                    # (in_dim, hidden)
    b1 = params["b1"].reshape(1, hidden).astype(jnp.float32)
    w2 = params["w2"].T.astype(jnp.bfloat16)                    # (hidden, hidden)
    b2 = params["b2"].reshape(1, hidden).astype(jnp.float32)
    w3 = params["w3"].T.astype(jnp.bfloat16)                    # (hidden, bottleneck)
    b3 = params["b3"].reshape(1, bottleneck).astype(jnp.float32)

    # weight_norm last layer: W_eff[o,:] = g[o] * v[o,:] / ||v[o,:]||.
    # Pass v.T (bf16) + a single (1, out_dim) f32 per-column scale; the scale is
    # folded into the kernel instead of materializing W_eff in HBM.
    v = params["v_last"]                                        # (out_dim, bottleneck)
    g = params["g_last"]                                        # (out_dim,)  (== 1.0)
    scale = (g / jnp.sqrt(jnp.sum(v * v, axis=1))).reshape(1, out_dim).astype(jnp.float32)
    vt = v.T.astype(jnp.bfloat16)                               # (bottleneck, out_dim)

    full2d = lambda shape: pl.BlockSpec(shape, lambda i: (0, 0))

    # --- kernel 1: MLP + L2 normalize.  Grid over batch tiles; the three MLP
    # weights have constant index_maps -> fetched once, resident across tiles.
    z = pl.pallas_call(
        _mlp_kernel,
        out_shape=jax.ShapeDtypeStruct((B, bottleneck), jnp.float32),
        grid=(B // bm,),
        in_specs=[
            pl.BlockSpec((bm, in_dim), lambda i: (i, 0)),       # x tile over batch
            full2d((in_dim, hidden)),
            full2d((1, hidden)),
            full2d((hidden, hidden)),
            full2d((1, hidden)),
            full2d((hidden, bottleneck)),
            full2d((1, bottleneck)),
        ],
        out_specs=pl.BlockSpec((bm, bottleneck), lambda i: (i, 0)),
        compiler_params=pltpu.CompilerParams(
            dimension_semantics=("parallel",),
            vmem_limit_bytes=vmem_limit_bytes),
    )(x, w1, b1, w2, b2, w3, b3)

    # --- kernel 2: tiled z @ v.T * scale.  Grid = (out tiles, batch tiles) with
    # out_dim as the OUTER (slow) axis so each (bottleneck, tn) weight tile is
    # DMA'd once and reused across every batch tile; output tiles are lane-dense.
    out = pl.pallas_call(
        _last_layer_kernel,
        out_shape=jax.ShapeDtypeStruct((B, out_dim), x.dtype),
        grid=(out_dim // tn, B // bm),
        in_specs=[
            pl.BlockSpec((bm, bottleneck), lambda oi, bi: (bi, 0)),   # z tile
            pl.BlockSpec((bottleneck, tn), lambda oi, bi: (0, oi)),   # v.T tile
            pl.BlockSpec((1, tn), lambda oi, bi: (0, oi)),            # scale row
        ],
        out_specs=pl.BlockSpec((bm, tn), lambda oi, bi: (bi, oi)),
        compiler_params=pltpu.CompilerParams(
            dimension_semantics=("arbitrary", "parallel"),
            vmem_limit_bytes=vmem_limit_bytes),
    )(z, vt, scale)
    return out


# -------------------------- test harness ------------------------------------


def init_params(key, in_dim, hidden, bottleneck, out_dim):
    """Deterministic synthetic init (std=0.02 normal for Linear weights, zero bias,
    weight_norm g filled with 1, as in DINOHead.__init__)."""
    ks = jax.random.split(key, 4)
    std = 0.02
    # TODO(synk): PyTorch uses trunc_normal_; plain normal*std used here (same moments).
    return {
        "w1": jax.random.normal(ks[0], (hidden, in_dim), jnp.float32) * std,
        "b1": jnp.zeros((hidden,), jnp.float32),
        "w2": jax.random.normal(ks[1], (hidden, hidden), jnp.float32) * std,
        "b2": jnp.zeros((hidden,), jnp.float32),
        "w3": jax.random.normal(ks[2], (bottleneck, hidden), jnp.float32) * std,
        "b3": jnp.zeros((bottleneck,), jnp.float32),
        "v_last": jax.random.normal(ks[3], (out_dim, bottleneck), jnp.float32) * std,
        "g_last": jnp.ones((out_dim,), jnp.float32),
    }


def reference_forward(x, params):
    h = jnp.maximum(x @ params["w1"].T + params["b1"], 0.0)
    h = jnp.maximum(h @ params["w2"].T + params["b2"], 0.0)
    z = h @ params["w3"].T + params["b3"]
    n = jnp.sqrt(jnp.sum(z * z, axis=-1, keepdims=True))
    z = z / jnp.maximum(n, 1e-12)
    v = params["v_last"]
    w_eff = params["g_last"][:, None] * v / jnp.sqrt(jnp.sum(v * v, axis=1, keepdims=True))
    return z @ w_eff.T


if __name__ == "__main__":
    # Small shapes consistent with the module (scaled down from 2048/2048/256/65536),
    # chosen so both grid axes get >1 tile with bm=16, tn=128.
    B, in_dim, hidden, bottleneck, out_dim = 32, 64, 128, 64, 256

    key = jax.random.PRNGKey(0)
    kx, kp = jax.random.split(key)
    x = jax.random.normal(kx, (B, in_dim), jnp.float32)
    params = init_params(kp, in_dim, hidden, bottleneck, out_dim)

    out = dino_head_forward(x, params, bm=16, tn=128)
    out = jax.block_until_ready(out)

    ref = reference_forward(x, params)
    assert out.shape == (B, out_dim)
    # bf16 matmul operands with f32 accumulation -> relaxed tolerance vs f32 reference.
    err = float(jnp.max(jnp.abs(out - ref)))
    assert jnp.allclose(out, ref, atol=2e-2, rtol=2e-2), err

    print("KERNEL_OK")
</pallas_src>

<mosaic_0001>
module attributes {stable_mosaic.version = 11 : i64} {
  func.func @_mlp_kernel(%arg0: i32, %arg1: memref<16x64xf32, #tpu.memory_space<vmem>>, %arg2: memref<64x128xbf16, #tpu.memory_space<vmem>>, %arg3: memref<1x128xf32, #tpu.memory_space<vmem>>, %arg4: memref<128x128xbf16, #tpu.memory_space<vmem>>, %arg5: memref<1x128xf32, #tpu.memory_space<vmem>>, %arg6: memref<128x64xbf16, #tpu.memory_space<vmem>>, %arg7: memref<1x64xf32, #tpu.memory_space<vmem>>, %arg8: memref<16x64xf32, #tpu.memory_space<vmem>>) attributes {dimension_semantics = [#tpu.dimension_semantics<parallel>], iteration_bounds = array<i64: 2>, scalar_prefetch = 0 : i64, scratch_operands = 0 : i64, tpu.core_type = #tpu.core_type<tc>, window_params = [{transform_indices = @transform_0, window_bounds = array<i64: 16, 64>}, {pipeline_mode = #tpu.pipeline_mode<synchronous>, transform_indices = @transform_1, window_bounds = array<i64: 64, 128>}, {pipeline_mode = #tpu.pipeline_mode<synchronous>, transform_indices = @transform_2, window_bounds = array<i64: 1, 128>}, {pipeline_mode = #tpu.pipeline_mode<synchronous>, transform_indices = @transform_3, window_bounds = array<i64: 128, 128>}, {pipeline_mode = #tpu.pipeline_mode<synchronous>, transform_indices = @transform_4, window_bounds = array<i64: 1, 128>}, {pipeline_mode = #tpu.pipeline_mode<synchronous>, transform_indices = @transform_5, window_bounds = array<i64: 128, 64>}, {pipeline_mode = #tpu.pipeline_mode<synchronous>, transform_indices = @transform_6, window_bounds = array<i64: 1, 64>}, {transform_indices = @transform_7, window_bounds = array<i64: 16, 64>}]} {
    %c0 = arith.constant 0 : index
    %c0_0 = arith.constant 0 : index
    %0 = vector.load %arg1[%c0, %c0_0] : memref<16x64xf32, #tpu.memory_space<vmem>>, vector<16x64xf32>
    %1 = arith.truncf %0 : vector<16x64xf32> to vector<16x64xbf16>
    %c0_1 = arith.constant 0 : index
    %c0_2 = arith.constant 0 : index
    %2 = vector.load %arg2[%c0_1, %c0_2] : memref<64x128xbf16, #tpu.memory_space<vmem>>, vector<64x128xbf16>
    %cst = arith.constant dense<0.000000e+00> : vector<16x128xf32>
    %3 = tpu.matmul %1, %2, %cst {dimension_numbers = #tpu.dot_dimension_numbers<[1], [0], [0], [1], [0, 0, 1, 1], [], []>} : vector<16x64xbf16>, vector<64x128xbf16>, vector<16x128xf32> -> vector<16x128xf32>
    %c0_3 = arith.constant 0 : index
    %c0_4 = arith.constant 0 : index
    %4 = vector.load %arg3[%c0_3, %c0_4] : memref<1x128xf32, #tpu.memory_space<vmem>>, vector<1x128xf32>
    %5 = vector.broadcast %4 : vector<1x128xf32> to vector<16x128xf32>
    %6 = arith.addf %3, %5 : vector<16x128xf32>
    %cst_5 = arith.constant 0.000000e+00 : f32
    %7 = vector.broadcast %cst_5 : f32 to vector<16x128xf32>
    %8 = arith.maximumf %6, %7 : vector<16x128xf32>
    %9 = arith.truncf %8 : vector<16x128xf32> to vector<16x128xbf16>
    %c0_6 = arith.constant 0 : index
    %c0_7 = arith.constant 0 : index
    %10 = vector.load %arg4[%c0_6, %c0_7] : memref<128x128xbf16, #tpu.memory_space<vmem>>, vector<128x128xbf16>
    %cst_8 = arith.constant dense<0.000000e+00> : vector<16x128xf32>
    %11 = tpu.matmul %9, %10, %cst_8 {dimension_numbers = #tpu.dot_dimension_numbers<[1], [0], [0], [1], [0, 0, 1, 1], [], []>} : vector<16x128xbf16>, vector<128x128xbf16>, vector<16x128xf32> -> vector<16x128xf32>
    %c0_9 = arith.constant 0 : index
    %c0_10 = arith.constant 0 : index
    %12 = vector.load %arg5[%c0_9, %c0_10] : memref<1x128xf32, #tpu.memory_space<vmem>>, vector<1x128xf32>
    %13 = vector.broadcast %12 : vector<1x128xf32> to vector<16x128xf32>
    %14 = arith.addf %11, %13 : vector<16x128xf32>
    %cst_11 = arith.constant 0.000000e+00 : f32
    %15 = vector.broadcast %cst_11 : f32 to vector<16x128xf32>
    %16 = arith.maximumf %14, %15 : vector<16x128xf32>
    %17 = arith.truncf %16 : vector<16x128xf32> to vector<16x128xbf16>
    %c0_12 = arith.constant 0 : index
    %c0_13 = arith.constant 0 : index
    %18 = vector.load %arg6[%c0_12, %c0_13] : memref<128x64xbf16, #tpu.memory_space<vmem>>, vector<128x64xbf16>
    %cst_14 = arith.constant dense<0.000000e+00> : vector<16x64xf32>
    %19 = tpu.matmul %17, %18, %cst_14 {dimension_numbers = #tpu.dot_dimension_numbers<[1], [0], [0], [1], [0, 0, 1, 1], [], []>} : vector<16x128xbf16>, vector<128x64xbf16>, vector<16x64xf32> -> vector<16x64xf32>
    %c0_15 = arith.constant 0 : index
    %c0_16 = arith.constant 0 : index
    %20 = vector.load %arg7[%c0_15, %c0_16] : memref<1x64xf32, #tpu.memory_space<vmem>>, vector<1x64xf32>
    %21 = vector.broadcast %20 : vector<1x64xf32> to vector<16x64xf32>
    %22 = arith.addf %19, %21 : vector<16x64xf32>
    %23 = arith.mulf %22, %22 : vector<16x64xf32>
    %cst_17 = arith.constant dense<0.000000e+00> : vector<16xf32>
    %24 = vector.multi_reduction <add>, %23, %cst_17 [1] : vector<16x64xf32> to vector<16xf32>
    %25 = vector.shape_cast %24 : vector<16xf32> to vector<16x1xf32>
    %cst_18 = arith.constant 1.000000e-24 : f32
    %26 = vector.broadcast %cst_18 : f32 to vector<16x1xf32>
    %27 = arith.maximumf %25, %26 : vector<16x1xf32>
    %28 = math.rsqrt %27 : vector<16x1xf32>
    %29 = vector.broadcast %28 : vector<16x1xf32> to vector<16x64xf32>
    %30 = arith.mulf %22, %29 : vector<16x64xf32>
    %c0_19 = arith.constant 0 : index
    %c0_20 = arith.constant 0 : index
    %31 = vector.load %arg8[%c0_19, %c0_20] : memref<16x64xf32, #tpu.memory_space<vmem>>, vector<16x64xf32>
    tpu.vector_store %arg8[%c0_19, %c0_20], %30 {strides = array<i32>} : memref<16x64xf32, #tpu.memory_space<vmem>>, vector<16x64xf32>,
    return
  }
  func.func @transform_0(%arg0: i32) -> (i32, i32) {
    %c0_i32 = arith.constant 0 : i32
    %c0_i32_0 = arith.constant 0 : i32
    return %arg0, %c0_i32 : i32, i32
  }
  func.func @transform_1(%arg0: i32) -> (i32, i32) {
    %c0_i32 = arith.constant 0 : i32
    %c0_i32_0 = arith.constant 0 : i32
    %c0_i32_1 = arith.constant 0 : i32
    return %c0_i32, %c0_i32_0 : i32, i32
  }
  func.func @transform_2(%arg0: i32) -> (i32, i32) {
    %c0_i32 = arith.constant 0 : i32
    %c0_i32_0 = arith.constant 0 : i32
    %c0_i32_1 = arith.constant 0 : i32
    return %c0_i32, %c0_i32_0 : i32, i32
  }
  func.func @transform_3(%arg0: i32) -> (i32, i32) {
    %c0_i32 = arith.constant 0 : i32
    %c0_i32_0 = arith.constant 0 : i32
    %c0_i32_1 = arith.constant 0 : i32
    return %c0_i32, %c0_i32_0 : i32, i32
  }
  func.func @transform_4(%arg0: i32) -> (i32, i32) {
    %c0_i32 = arith.constant 0 : i32
    %c0_i32_0 = arith.constant 0 : i32
    %c0_i32_1 = arith.constant 0 : i32
    return %c0_i32, %c0_i32_0 : i32, i32
  }
  func.func @transform_5(%arg0: i32) -> (i32, i32) {
    %c0_i32 = arith.constant 0 : i32
    %c0_i32_0 = arith.constant 0 : i32
    %c0_i32_1 = arith.constant 0 : i32
    return %c0_i32, %c0_i32_0 : i32, i32
  }
  func.func @transform_6(%arg0: i32) -> (i32, i32) {
    %c0_i32 = arith.constant 0 : i32
    %c0_i32_0 = arith.constant 0 : i32
    %c0_i32_1 = arith.constant 0 : i32
    return %c0_i32, %c0_i32_0 : i32, i32
  }
  func.func @transform_7(%arg0: i32) -> (i32, i32) {
    %c0_i32 = arith.constant 0 : i32
    %c0_i32_0 = arith.constant 0 : i32
    return %arg0, %c0_i32 : i32, i32
  }
}

</mosaic_0001>

<bundles_post_ra>
// kernel: tpu_custom_call.1
= control target key start
LH: loop header
LB: loop body
LE: loop exit
PB: predicated region body
PF: predicated region fallthrough
CT: control target
= control target key end

     0   :  { %12 = vsyncpa [#allocation3], 0  ;;  %s1125_s0 = inlined_call_operand.vmem [shape: f32[32,64], index: 0, kind: input, shape index: {}]   ;;  %s1126_s1 = inlined_call_operand.hbm [shape: bf16[64,128], index: 1, kind: input, shape index: {}]   ;;  %s1127_s2 = inlined_call_operand.vmem [shape: f32[1,128], index: 2, kind: input, shape index: {}]   ;;  %s1128_s3 = inlined_call_operand.vmem [shape: bf16[128,128], index: 3, kind: input, shape index: {}]   ;;  %s1129_s4 = inlined_call_operand.vmem [shape: f32[1,128], index: 4, kind: input, shape index: {}]   ;;  %s1130_s5 = inlined_call_operand.vmem [shape: bf16[128,64], index: 5, kind: input, shape index: {}]   ;;  %s1131_s6 = inlined_call_operand.vmem [shape: f32[1,64], index: 6, kind: input, shape index: {}]   ;;  %s1132_s7 = inlined_call_operand.hbm [shape: f32[32,64], index: 7, kind: output, shape index: {}]  }
   0x1   :  { %13 = vsyncpa [#allocation4], 0 }
   0x2   :  { %15 = vsyncpa [#allocation4 + $0x1], 0  ;;  %s969_s24 = smov 0   ;;  %s971_s25 = smov 0  }
   0x3   :  { %s973_s26 = smov 0   ;;  %s975_s27 = smov 0  }
   0x4 LB: > { %s990_s28 = sadd.s32 4294967295, %s922_s27   ;;  %s649_s29 = sadd.s32 4294967294, %s922_s27   ;;  %s922_s27 = sphi %s975_s27, %s1138_s27   ;;  %s918_s26 = sphi %s973_s26, %s1137_s26   ;;  %s914_s25 = sphi %s971_s25, %s1136_s25   ;;  %s910_s24 = sphi %s969_s24, %s1135_s24  }
   0x5   : > { %s994_s30 = sadd.s32 1, %s922_s27   ;;  %s180_s8 = sadd.s32 1, %s918_s26 }
   0x6   : > { %s177_s9 = ssub.s32 %s922_s27, %s994_s30  ;;  %p190_p0 = scmp.ne.s32.totalorder %s918_s26, %s914_s25 }
   0x7   : > { %p178_p1 = scmp.eq.s32.totalorder %s177_s9, 0  ;;  %p191_p2 = scmp.eq.s32.totalorder %s990_s28, 1 }
   0x8   : > { %p196_p3 = scmp.ne.s32.totalorder %s914_s25, %s910_s24  ;;  %p197_p4 = scmp.eq.s32.totalorder %s649_s29, 1 }
   0x9   : > { %s1005_s10 = scalar_select %p178_p1, %s918_s26, %s180_s8  }
   0xa   : > { %p1007_p5 = por %p191_p2, %p190_p0  ;;  %p1011_p6 = por %p197_p4, %p196_p3 }
   0xb   : > { %p650_p7 = scmp.ge.s32.totalorder %s922_s27, 1  ;;  %p204_p8 = scmp.lt.s32.totalorder %s922_s27, 3 }
   0xc   : > { %p779_p9 = scmp.eq.s32.totalorder %s990_s28, 0  ;;  %s215_s15 = sshll.u32 %s1126_s1, 4  ;;  %s216_s15 = int_to_ptr.hbm [resolvable:$true] %s215_s15 }
   0xd   : > { %p205_p10 = pnand %p650_p7, %p204_p8  ;;  %s924_s16 = smov [#allocation2]  }
   0xe   : > { %s217_s17 = sshll.u32 %s924_s16, 4  ;;  %s925_s18 = smov 64   ;;  %s218_s17 = int_to_ptr.vmem [resolvable:$true] %s217_s17 }
   0xf   : > { %p771_p11 = pneg %p205_p10  ;;  %s926_s19 = smov 4  }
  0x10   : > { %257 = sbr.rel (%p205_p10) target bundleno = 605 (0x25d), region = 48 }
  0x11   : > { %p772_p12 = pnand %p779_p9, %p771_p11 }
  0x13   : > { %774 = dma.hbm_to_vmem [thread:$0]  (!%p772_p12), %s216_s15, 512, %s218_s17, [#allocation3], %s925_s18, %s925_s18, %s926_s19  }
  0x15   : > { %901 = dma.done.wait (%p779_p9), [#allocation3], 512  }
  0x16   : > { %903 = vsyncadd (%p779_p9), [#allocation3], 4294966784  ;;  %s656_s20 = sshll.u32 %s990_s28, 1  ;;  %v747_v0 = vld [vmem:[#allocation2 + $0x18] sm:$0xff]  ;;  %v746_v1 = vld [vmem:[#allocation2 + $0x10] sm:$0xff]  ;;  %vm337_vm0 = vcmask 523264  }
  0x17   : > { %p291_p13 = scmp.lt.s32.totalorder %s656_s20, 3  ;;  %345 = vmatpush.bf16.msra.mxu0 %v747_v0  ;;  %v755_v2 = vld [vmem:[%s1128_s3 + $0x38] sm:$0xff]  ;;  %v754_v3 = vld [vmem:[%s1128_s3 + $0x30] sm:$0xff]  ;;  %v745_v4 = vld [vmem:[#allocation2 + $0x8] sm:$0xff]  ;;  %s287_s21 = sand.u32 1, %s914_s25  }
  0x18   : > { %426 = vmatpush.bf16.msra.mxu1 %v755_v2  ;;  %v753_v5 = vld [vmem:[%s1128_s3 + $0x28] sm:$0xff]  ;;  %v744_v6 = vld [vmem:[#allocation2] sm:$0xff]  ;;  %v751_v11 = vld [vmem:[%s1128_s3 + $0x18] sm:$0xff]  ;;  %s655_s22 = sshll.u32 %s287_s21, 4 }
  0x19   : > { %s1140_s20 = smov (!%p291_p13, %s656_s20), 3  ;;  %v752_v9 = vld [vmem:[%s1128_s3 + $0x20] sm:$0xff]  ;;  %v750_v12 = vld [vmem:[%s1128_s3 + $0x10] sm:$0xff]  ;;  %v749_v13 = vld [vmem:[%s1128_s3 + $0x8] sm:$0xff]  ;;  %s289_s13 = scalar_lea.vmem [#allocation5], %s655_s22 }
  0x1a   : > { %s657_s23 = sshll.u32 %s1140_s20, 3  ;;  %v748_v14 = vld [vmem:[%s1128_s3] sm:$0xff]  ;;  %v763_v15 = vld [vmem:[%s1130_s5 + $0x38] sm:$0xff]  ;;  %v762_v16 = vld [vmem:[%s1130_s5 + $0x30] sm:$0xff]  ;;  %s876_s20 = scalar_lea.hbm %s1132_s7, 32 }
  0x1b   : > { %346 = vmatpush.bf16.msra.mxu0 %v746_v1  ;;  %s294_s14 = scalar_lea.vmem %s1125_s0, %s657_s23  ;;  %511 = vmatpush.bf16.msra.mxu2 %v763_v15  ;;  %v761_v17 = vld [vmem:[%s1130_s5 + $0x28] sm:$0xff]  ;;  %v760_v18 = vld [vmem:[%s1130_s5 + $0x20] sm:$0xff]  ;;  %v759_v27 = vld [vmem:[%s1130_s5 + $0x18] sm:$0xff]  ;;  %s764_s23 = sshll.u32 %s990_s28, 4 }
  0x1c   : > { %427 = vmatpush.bf16.msra.mxu1 %v754_v3  ;;  %v298_v7 = vld [vmem:[%s294_s14] sm:$0xff]  ;;  %v299_v8 = vld [vmem:[%s294_s14 + $0x8] sm:$0xff]  ;;  %v758_v28 = vld [vmem:[%s1130_s5 + $0x10] sm:$0xff]  ;;  %s571_s9 = scalar_lea.hbm %s1132_s7, %s764_s23  ;;  %s572_s14 = sshll.u32 %s289_s13, 4  ;;  %s573_s14 = int_to_ptr.vmem [resolvable:$true] %s572_s14 }
  0x1d   : > { %v300_v10 = vpack.c.bf16 %v299_v8, %v298_v7  ;;  %v819_v20 = vld [vmem:[%s1127_s2] ss:$0 sm:$0xff]  ;;  %v757_v29 = vld [vmem:[%s1130_s5 + $0x8] sm:$0xff]  ;;  %s574_s15 = sshll.u32 %s571_s9, 4  ;;  %s560_s28 = scalar_lea.sflag [#allocation4], %s287_s21  ;;  %s575_s15 = int_to_ptr.hbm [resolvable:$true] %s574_s15 }
  0x1e   : > { %v756_v30 = vld [vmem:[%s1130_s5] sm:$0xff]  ;;  %s870_s16 = sshra.s32 %s575_s15, 4  ;;  %s871_s16 = int_to_ptr.hbm [resolvable:$true] %s870_s16 }
  0x1f   : > { %347 = vmatpush.bf16.msra.mxu0 %v745_v4  ;;  %512 = vmatpush.bf16.msra.mxu2 %v762_v16  ;;  %v820_v32 = vld [vmem:[%s1129_s4] ss:$0 sm:$0xff]  ;;  %s872_s17 = scalar_lea.hbm %s871_s16, 16  ;;  %p877_p3 = scmp.lt.s32.totalorder %s871_s16, %s1132_s7 }
  0x20   : > { %428 = vmatpush.bf16.msra.mxu1 %v753_v5  ;;  %v821_v39 = vld [vmem:[%s1131_s6] ss:$0 sm:$0xff]  ;;  %p873_p0 = scmp.ne.s32.totalorder %s871_s16, %s872_s17  ;;  %p878_p4 = scmp.lt.s32.totalorder %s876_s20, %s872_s17 }
  0x22   : > { %p874_p1 = pnand %p873_p0, %p1007_p5  ;;  %p879_p7 = por %p878_p4, %p877_p3 }
  0x23   : > { %348 = vmatpush.bf16.msra.mxu0 %v744_v6  ;;  %513 = vmatpush.bf16.msra.mxu2 %v761_v17 }
  0x24   : > { %429 = vmatpush.bf16.msra.mxu1 %v752_v9  ;;  %p875_p2 = pneg %p874_p1 }
  0x26   : > { %674 = vmatmul.msk.bf16.vlgmr.msra.gmra.mxu0 %vm337_vm0, %v300_v10  ;;  %p880_p8 = pnand %p879_p7, %p875_p2 }
  0x27   : > { %514 = vmatpush.bf16.msra.mxu2 %v760_v18 }
  0x28   : > { %430 = vmatpush.bf16.msra.mxu1 %v751_v11 }
  0x2b   : > { %515 = vmatpush.bf16.msra.mxu2 %v759_v27 }
  0x2c   : > { %431 = vmatpush.bf16.msra.mxu1 %v750_v12 }
  0x2f   : > { %516 = vmatpush.bf16.msra.mxu2 %v758_v28 }
  0x30   : > { %432 = vmatpush.bf16.msra.mxu1 %v749_v13 }
  0x33   : > { %517 = vmatpush.bf16.msra.mxu2 %v757_v29 }
  0x34   : > { %433 = vmatpush.bf16.msra.mxu1 %v748_v14 }
  0x37   : > { %518 = vmatpush.bf16.msra.mxu2 %v756_v30 }
  0xa3   : > { %v350_v19 = vpop.f32.mrf.mxu0 }
  0xa4   : > { %v351_v21 = vadd.f32 %v819_v20, %v350_v19 }
  0xa6   : > { %v355_v24 = vmax.f32 %v351_v21, 0.0 }
  0xab   : > { %v352_v22 = vpop.f32.mrf.mxu0 }
  0xac   : > { %v353_v23 = vadd.f32 %v819_v20, %v352_v22 }
  0xae   : > { %v356_v25 = vmax.f32 %v353_v23, 0.0 }
  0xb0   : > { %v357_v26 = vpack.c.bf16 %v356_v25, %v355_v24 }
  0xb2   : > { %434 = vmatmul.bf16.vlgmr.msra.gmra.mxu1 %v357_v26 }
 0x12f   : > { %v435_v31 = vpop.f32.mrf.mxu1 }
 0x130   : > { %v436_v33 = vadd.f32 %v820_v32, %v435_v31 }
 0x132   : > { %v440_v36 = vmax.f32 %v436_v33, 0.0 }
 0x137   : > { %v437_v34 = vpop.f32.mrf.mxu1 }
 0x138   : > { %v438_v35 = vadd.f32 %v820_v32, %v437_v34 }
 0x13a   : > { %v441_v37 = vmax.f32 %v438_v35, 0.0 }
 0x13c   : > { %v442_v38 = vpack.c.bf16 %v441_v37, %v440_v36 }
 0x13e   : > { %519 = vmatmul.bf16.vlgmr.msra.gmra.mxu2 %v442_v38 }
 0x1c1   : > { %v520_v40 = vpop.f32.mrf.mxu2 }
 0x1c2   : > { %v521_v41 = vadd.f32 %v821_v39, %v520_v40 }
 0x1c4   : > { %v525_v42 = vmul.f32 %v521_v41, %v521_v41 }
 0x1c6   : > { %v527_v43 = vsel %vm337_vm0, %v525_v42, 0.0 }
 0x1c7   : > { %528 = vadd.xlane.f32.xlu0 %v527_v43 }
 0x1c9   : > { %v522_v44 = vpop.f32.mrf.mxu2 }
 0x1ca   : > { %v523_v45 = vadd.f32 %v821_v39, %v522_v44 }
 0x1cc   : > { %v526_v46 = vmul.f32 %v523_v45, %v523_v45 }
 0x1ce   : > { %v530_v47 = vsel %vm337_vm0, %v526_v46, 0.0 }
 0x1cf   : > { %531 = vadd.xlane.f32.xlu0 %v530_v47 }
 0x23a   : > { %v529_v48 = vpop.xlane.xlu0 %528 }
 0x23b   : > { %v533_v49 = vmax.f32 %v529_v48, 1e-24 }
 0x23d   : > { %822 = vrsqrt.f32 %v533_v49  ;;  %vm541_vm2 = vweird.f32 %v533_v49 }
 0x242   : > { %v532_v50 = vpop.xlane.xlu0 %531 }
 0x243   : > { %v823_v51 = vpop.eup %822  ;;  %v534_v52 = vmax.f32 %v532_v50, 1e-24 }
 0x244   : > { %v536_v53 = vmul.f32 %v823_v51, %v533_v49  ;;  %vm542_vm1 = vweird.f32 %v823_v51 }
 0x245   : > { %824 = vrsqrt.f32 %v534_v52  ;;  %vm543_vm3 = vmor %vm541_vm2, %vm542_vm1  ;;  %vm551_vm5 = vweird.f32 %v534_v52 }
 0x246   : > { %v537_v54 = vmul.f32 %v823_v51, %v536_v53 }
 0x248   : > { %v538_v55 = vmul.f32 0.5, %v537_v54 }
 0x24a   : > { %v539_v56 = vsub.f32 1.5, %v538_v55 }
 0x24b   : > { %v825_v57 = vpop.eup %824 }
 0x24c   : > { %v540_v58 = vmul.f32 %v823_v51, %v539_v56  ;;  %v546_v59 = vmul.f32 %v825_v57, %v534_v52  ;;  %vm552_vm4 = vweird.f32 %v825_v57 }
 0x24d   : > { %vm553_vm6 = vmor %vm551_vm5, %vm552_vm4 }
 0x24e   : > { %v544_v60 = vsel %vm543_vm3, %v823_v51, %v540_v58  ;;  %v547_v61 = vmul.f32 %v825_v57, %v546_v59 }
 0x24f   : > { %v555_v62 = vmul.f32 %v544_v60, %v521_v41 }
 0x250   : > { %v548_v63 = vmul.f32 0.5, %v547_v61 }
 0x251   : > { %557 = vst.msk [vmem:[%s289_s13] sm:$0xff] %vm337_vm0, %v555_v62 }
 0x252   : > { %v549_v0 = vsub.f32 1.5, %v548_v63 }
 0x254   : > { %v550_v1 = vmul.f32 %v825_v57, %v549_v0 }
 0x256   : > { %v554_v2 = vsel %vm553_vm6, %v825_v57, %v550_v1 }
 0x257   : > { %v556_v3 = vmul.f32 %v554_v2, %v523_v45 }
 0x259   : > { %558 = vst.msk [vmem:[%s289_s13 + $0x8] sm:$0xff] %vm337_vm0, %v556_v3 }
 0x25a   : > { %883 = shalt.err (!%p880_p8)
}
 0x25b   : > { %s927_s21 = smov 128   ;;  %s928_s29 = smov 8  }
 0x25c   : > { %769 = dma.vmem_to_hbm [thread:$0]  (%p1007_p5), %s573_s14, 256, %s575_s15, %s560_s28, %s927_s21, %s927_s21, %s928_s29  }
 0x25d PF: > { %p781_p9 = scmp.ge.s32.totalorder %s922_s27, 2  ;;  %s589_s8 = sand.u32 1, %s910_s24  }
 0x25e   : > { %s590_s9 = scalar_lea.sflag [#allocation4], %s589_s8 }
 0x25f   : > { %p776_p10 = pnand %p781_p9, %p1011_p6 }
 0x261   : > { %p777_p11 = pneg %p776_p10 }
 0x263   : > { %905 = dma.done.wait (%p777_p11), %s590_s9, 256  }
 0x264   : > { %907 = vsyncadd (%p777_p11), %s590_s9, 4294967040  ;;  %p18_p12 = scmp.ge.s32.totalorder %s994_s30, 4   ;;  %s1135_s24 = smov %s914_s25 }
 0x265   : > { %s1136_s25 = smov %s918_s26  ;;  %s1137_s26 = smov %s1005_s10 }
 0x266   : > { %s1138_s27 = smov %s994_s30  ;;  %20 = sbr.rel (!%p18_p12) target bundleno = 4 (0x4), region = 88 }
 0x26b   :  { %596 = vsyncpa [#allocation3], 1 }
 0x26c   :  { %598 = vsyncpa [#allocation3 + $0x1], 1 }
 0x26d   :  { %599 = vsyncpa [#allocation4], 1 }
 0x26e   :  { %601 = vsyncpa [#allocation4 + $0x1], 1 }

</bundles_post_ra>
